<compile_context>
chip_gen: v7x
topology: tpu7x:2x2x1
jax: 0.10.0
libtpu: 0.0.40
codegen_flags: <defaults>
</compile_context>

<pallas_src>
import functools

import jax
import jax.numpy as jnp
from jax.experimental import pallas as pl
from jax.experimental.pallas import tpu as pltpu


def _ln_kernel(x_ref, g_ref, o_ref, *, eps):
    # x_ref: (tN, C, tR, 128); g_ref: (1, C, 1, 1) float32.  bias=False path.
    x = x_ref[...].astype(jnp.float32)
    mean = jnp.mean(x, axis=1, keepdims=True)
    mean_sq = jnp.mean(x * x, axis=1, keepdims=True)
    var = jnp.maximum(mean_sq - mean * mean, 0.0)   # single-pass, f32, clamped
    inv = jax.lax.rsqrt(var + eps)
    y = (x - mean) * inv * g_ref[...]
    o_ref[...] = y.astype(o_ref.dtype)


def _ln_bias_kernel(x_ref, g_ref, b_ref, o_ref, *, eps):
    # x_ref: (tN, C, tR, 128); g_ref/b_ref: (1, C, 1, 1) float32.
    x = x_ref[...].astype(jnp.float32)
    mean = jnp.mean(x, axis=1, keepdims=True)
    mean_sq = jnp.mean(x * x, axis=1, keepdims=True)
    var = jnp.maximum(mean_sq - mean * mean, 0.0)
    inv = jax.lax.rsqrt(var + eps)
    y = (x - mean) * inv * g_ref[...] + b_ref[...]
    o_ref[...] = y.astype(o_ref.dtype)


@functools.lru_cache(maxsize=1)
def _tpu_memory_config():
    """(vmem_limit_bytes, num_tensorcores) for the current TPU generation."""
    vmem_capacity = 128 * 1024 * 1024
    try:
        vmem_capacity = int(pltpu.get_tpu_info().vmem_capacity_bytes)
    except Exception:
        pass
    num_tc = 1
    try:
        if "v7" in jax.devices()[0].device_kind.lower():
            num_tc = 2
    except Exception:
        pass
    if vmem_capacity <= 64 * 1024 * 1024:
        # v7x-class: 64 MiB physical per TensorCore, 2 TCs per chip.
        num_tc = max(num_tc, 2)
        vmem_limit = 48 * 1024 * 1024
    else:
        # v5e / v6e: 128 MiB physical, single TensorCore.
        vmem_limit = 96 * 1024 * 1024
    return vmem_limit, num_tc


def _largest_divisor_leq(n, cap):
    cap = max(1, min(n, int(cap)))
    for d in range(cap, 0, -1):
        if n % d == 0:
            return d
    return 1


def _choose_tiles(N, C, R, max_block_elems, num_tc, itemsize):
    """Pick (tN, tR, grid_n, grid_r) for blocks of shape (tN, C, tR, 128)."""
    row_elems = C * 128
    sample_elems = row_elems * R

    if sample_elems <= max_block_elems:
        # Whole sample fits one block; fold batch to amortize per-step overhead.
        tR = R
        tN = _largest_divisor_leq(N, max_block_elems // sample_elems)
    else:
        # Split the spatial rows in sublane-aligned (multiple-of-8) chunks.
        # The ragged last block (if any) only touches padded columns, which
        # the wrapper slices away.
        # TODO(synk): if C alone exceeds the budget a streaming reduction over
        # C would be needed; not required for this module's channel counts.
        cap_rows = max(8, (max_block_elems // row_elems) // 8 * 8)
        tR = R if cap_rows >= R else cap_rows
        tN = 1

    grid_n = N // tN
    grid_r = pl.cdiv(R, tR)

    # v7x: if everything landed in a single grid step, split so both
    # TensorCores get work -- but only when the block is big enough for the
    # extra ~0.35us per-step overhead to be worth it.
    if num_tc >= 2 and grid_n * grid_r == 1:
        block_bytes = tN * C * tR * 128 * itemsize
        if block_bytes >= (1 << 20):
            if N >= 2:
                tN = _largest_divisor_leq(N, N // 2)
                grid_n = N // tN
            elif R >= 16:
                half = ((R + 1) // 2 + 7) // 8 * 8
                if half < R:
                    tR = half
                    grid_r = pl.cdiv(R, tR)

    return tN, tR, grid_n, grid_r


def layer_norm_3d(x, g, b=None):
    """Channel LayerNorm for 5D NCDHW tensors (PyTorch `LayerNorm` module).

    x: (N, C, D, H, W); g: (1, C, 1, 1, 1); b: (1, C, 1, 1, 1) or None.
    Matches: (x - mean) * rsqrt(var + eps) * g + (b or 0), reduction over C,
    biased variance, eps = 1e-5 for float32 inputs else 1e-3.
    """
    N, C, D, H, W = x.shape
    S = D * H * W
    eps = 1e-05 if x.dtype == jnp.float32 else 1e-03

    # Lane-dense spatial layout: pad S to a multiple of 128 and fold into
    # (rows, 128) minor dims.  C becomes an outer (VPU-reduced) axis.
    Sp = ((S + 127) // 128) * 128
    R = Sp // 128
    x3 = x.reshape(N, C, S)
    if Sp != S:
        x3 = jnp.pad(x3, ((0, 0), (0, 0), (0, Sp - S)))
    x4 = x3.reshape(N, C, R, 128)

    # Affine params stay float32 (tiny, DMA'd once, no bf16 round-trip).
    g4 = g.reshape(1, C, 1, 1).astype(jnp.float32)

    vmem_limit, num_tc = _tpu_memory_config()
    itemsize = jnp.dtype(x.dtype).itemsize
    # Per-element VMEM cost: 2x double-buffered input + output tiles in the
    # storage dtype, plus ~2 full-tile float32 compute temporaries.
    per_elem_bytes = 4 * itemsize + 8
    max_block_elems = max((vmem_limit * 7 // 10) // per_elem_bytes, C * 128)

    tN, tR, grid_n, grid_r = _choose_tiles(N, C, R, max_block_elems, num_tc, itemsize)

    x_spec = pl.BlockSpec((tN, C, tR, 128), lambda n, r: (n, 0, r, 0))
    p_spec = pl.BlockSpec((1, C, 1, 1), lambda n, r: (0, 0, 0, 0))

    if b is None:
        kernel = functools.partial(_ln_kernel, eps=eps)
        in_specs = [x_spec, p_spec]
        operands = (x4, g4)
    else:
        kernel = functools.partial(_ln_bias_kernel, eps=eps)
        in_specs = [x_spec, p_spec, p_spec]
        operands = (x4, g4, b.reshape(1, C, 1, 1).astype(jnp.float32))

    out4 = pl.pallas_call(
        kernel,
        out_shape=jax.ShapeDtypeStruct((N, C, R, 128), x.dtype),
        grid_spec=pltpu.PrefetchScalarGridSpec(
            num_scalar_prefetch=0,
            grid=(grid_n, grid_r),
            in_specs=in_specs,
            out_specs=pl.BlockSpec((tN, C, tR, 128), lambda n, r: (n, 0, r, 0)),
        ),
        compiler_params=pltpu.CompilerParams(
            dimension_semantics=("parallel", "parallel"),
            vmem_limit_bytes=vmem_limit,
        ),
    )(*operands)

    out3 = out4.reshape(N, C, Sp)
    if Sp != S:
        out3 = out3[:, :, :S]
    return out3.reshape(N, C, D, H, W)


def _reference(x, g, b=None):
    eps = 1e-05 if x.dtype == jnp.float32 else 1e-03
    xf = x.astype(jnp.float32)
    mean = jnp.mean(xf, axis=1, keepdims=True)
    var = jnp.mean(jnp.square(xf - mean), axis=1, keepdims=True)
    y = (xf - mean) * jax.lax.rsqrt(var + eps) * g.astype(jnp.float32)
    if b is not None:
        y = y + b.astype(jnp.float32)
    return y.astype(x.dtype)


if __name__ == "__main__":
    key = jax.random.PRNGKey(0)
    kx, kg, kb, kx2 = jax.random.split(key, 4)

    # Shapes consistent with MultiDecoder3D's concat_conv LayerNorm input
    # (N, out_channels*2, D, H, W) after pixel-shuffle + upsample + concat.
    N, C, D, H, W = 2, 4, 4, 8, 8
    x = jax.random.normal(kx, (N, C, D, H, W), dtype=jnp.float32)

    # 1) Module default: bias=False, gamma initialized to ones; S % 128 == 0.
    g_ones = jnp.ones((1, C, 1, 1, 1), dtype=jnp.float32)
    out = jax.block_until_ready(layer_norm_3d(x, g_ones, None))
    ref = _reference(x, g_ones, None)
    assert out.shape == x.shape and out.dtype == x.dtype
    assert jnp.allclose(out, ref, atol=2e-5, rtol=1e-5)

    # 2) Affine path (bias=True) with non-trivial gamma/beta and a spatial
    #    size that is NOT a multiple of 128 (exercises the padding path).
    C2, D2, H2, W2 = 8, 3, 5, 7
    x2 = jax.random.normal(kx2, (1, C2, D2, H2, W2), dtype=jnp.float32)
    g_rand = jax.random.normal(kg, (1, C2, 1, 1, 1), dtype=jnp.float32)
    b_rand = jax.random.normal(kb, (1, C2, 1, 1, 1), dtype=jnp.float32)
    out2 = jax.block_until_ready(layer_norm_3d(x2, g_rand, b_rand))
    ref2 = _reference(x2, g_rand, b_rand)
    assert out2.shape == x2.shape and out2.dtype == x2.dtype
    assert jnp.allclose(out2, ref2, atol=2e-5, rtol=1e-5)

    print("KERNEL_OK")
</pallas_src>

<mosaic_0001>
module attributes {stable_mosaic.version = 11 : i64} {
  func.func @_ln_kernel(%arg0: i32, %arg1: i32, %arg2: memref<2x4x2x128xf32, #tpu.memory_space<vmem>>, %arg3: memref<1x4x1x1xf32, #tpu.memory_space<vmem>>, %arg4: memref<2x4x2x128xf32, #tpu.memory_space<vmem>>) attributes {dimension_semantics = [#tpu.dimension_semantics<parallel>, #tpu.dimension_semantics<parallel>], iteration_bounds = array<i64: 1, 1>, scalar_prefetch = 0 : i64, scratch_operands = 0 : i64, tpu.core_type = #tpu.core_type<tc>, window_params = [{transform_indices = @transform_0, window_bounds = array<i64: 2, 4, 2, 128>}, {pipeline_mode = #tpu.pipeline_mode<synchronous>, transform_indices = @transform_1, window_bounds = array<i64: 1, 4, 1, 1>}, {transform_indices = @transform_2, window_bounds = array<i64: 2, 4, 2, 128>}]} {
    %c0 = arith.constant 0 : index
    %c0_0 = arith.constant 0 : index
    %c0_1 = arith.constant 0 : index
    %c0_2 = arith.constant 0 : index
    %0 = vector.load %arg2[%c0, %c0_0, %c0_1, %c0_2] : memref<2x4x2x128xf32, #tpu.memory_space<vmem>>, vector<2x4x2x128xf32>
    %cst = arith.constant dense<0.000000e+00> : vector<2x2x128xf32>
    %1 = vector.multi_reduction <add>, %0, %cst [1] : vector<2x4x2x128xf32> to vector<2x2x128xf32>
    %2 = vector.shape_cast %1 : vector<2x2x128xf32> to vector<2x1x2x128xf32>
    %cst_3 = arith.constant 4.000000e+00 : f32
    %3 = vector.broadcast %cst_3 : f32 to vector<2x1x2x128xf32>
    %4 = arith.divf %2, %3 : vector<2x1x2x128xf32>
    %5 = arith.mulf %0, %0 : vector<2x4x2x128xf32>
    %cst_4 = arith.constant dense<0.000000e+00> : vector<2x2x128xf32>
    %6 = vector.multi_reduction <add>, %5, %cst_4 [1] : vector<2x4x2x128xf32> to vector<2x2x128xf32>
    %7 = vector.shape_cast %6 : vector<2x2x128xf32> to vector<2x1x2x128xf32>
    %cst_5 = arith.constant 4.000000e+00 : f32
    %8 = vector.broadcast %cst_5 : f32 to vector<2x1x2x128xf32>
    %9 = arith.divf %7, %8 : vector<2x1x2x128xf32>
    %10 = arith.mulf %4, %4 : vector<2x1x2x128xf32>
    %11 = arith.subf %9, %10 : vector<2x1x2x128xf32>
    %cst_6 = arith.constant 0.000000e+00 : f32
    %12 = vector.broadcast %cst_6 : f32 to vector<2x1x2x128xf32>
    %13 = arith.maximumf %11, %12 : vector<2x1x2x128xf32>
    %cst_7 = arith.constant 9.99999974E-6 : f32
    %14 = vector.broadcast %cst_7 : f32 to vector<2x1x2x128xf32>
    %15 = arith.addf %13, %14 : vector<2x1x2x128xf32>
    %16 = math.rsqrt %15 : vector<2x1x2x128xf32>
    %17 = vector.broadcast %4 : vector<2x1x2x128xf32> to vector<2x4x2x128xf32>
    %18 = arith.subf %0, %17 : vector<2x4x2x128xf32>
    %19 = vector.broadcast %16 : vector<2x1x2x128xf32> to vector<2x4x2x128xf32>
    %20 = arith.mulf %18, %19 : vector<2x4x2x128xf32>
    %c0_8 = arith.constant 0 : index
    %c0_9 = arith.constant 0 : index
    %c0_10 = arith.constant 0 : index
    %c0_11 = arith.constant 0 : index
    %21 = vector.load %arg3[%c0_8, %c0_9, %c0_10, %c0_11] : memref<1x4x1x1xf32, #tpu.memory_space<vmem>>, vector<1x4x1x1xf32>
    %22 = vector.broadcast %21 : vector<1x4x1x1xf32> to vector<2x4x2x128xf32>
    %23 = arith.mulf %20, %22 : vector<2x4x2x128xf32>
    %c0_12 = arith.constant 0 : index
    %c0_13 = arith.constant 0 : index
    %c0_14 = arith.constant 0 : index
    %c0_15 = arith.constant 0 : index
    %24 = vector.load %arg4[%c0_12, %c0_13, %c0_14, %c0_15] : memref<2x4x2x128xf32, #tpu.memory_space<vmem>>, vector<2x4x2x128xf32>
    tpu.vector_store %arg4[%c0_12, %c0_13, %c0_14, %c0_15], %23 {strides = array<i32>} : memref<2x4x2x128xf32, #tpu.memory_space<vmem>>, vector<2x4x2x128xf32>,
    return
  }
  func.func @transform_0(%arg0: i32, %arg1: i32) -> (i32, i32, i32, i32) {
    %c0_i32 = arith.constant 0 : i32
    %c0_i32_0 = arith.constant 0 : i32
    %c0_i32_1 = arith.constant 0 : i32
    return %arg0, %c0_i32, %arg1, %c0_i32_0 : i32, i32, i32, i32
  }
  func.func @transform_1(%arg0: i32, %arg1: i32) -> (i32, i32, i32, i32) {
    %c0_i32 = arith.constant 0 : i32
    %c0_i32_0 = arith.constant 0 : i32
    %c0_i32_1 = arith.constant 0 : i32
    %c0_i32_2 = arith.constant 0 : i32
    %c0_i32_3 = arith.constant 0 : i32
    return %c0_i32, %c0_i32_0, %c0_i32_1, %c0_i32_2 : i32, i32, i32, i32
  }
  func.func @transform_2(%arg0: i32, %arg1: i32) -> (i32, i32, i32, i32) {
    %c0_i32 = arith.constant 0 : i32
    %c0_i32_0 = arith.constant 0 : i32
    %c0_i32_1 = arith.constant 0 : i32
    return %arg0, %c0_i32, %arg1, %c0_i32_0 : i32, i32, i32, i32
  }
}

</mosaic_0001>

<bundles_post_ra>
// kernel: tpu_custom_call.1
= control target key start
LH: loop header
LB: loop body
LE: loop exit
PB: predicated region body
PF: predicated region fallthrough
CT: control target
= control target key end

     0   :  { %7 = vsyncpa [#allocation3], 0  ;;  %s391_s0 = inlined_call_operand.hbm [shape: f32[2,4,2,128], index: 0, kind: input, shape index: {}]   ;;  %s392_s1 = inlined_call_operand.hbm [shape: f32[1,4,1,1], index: 1, kind: input, shape index: {}]   ;;  %s393_s2 = inlined_call_operand.hbm [shape: f32[2,4,2,128], index: 2, kind: output, shape index: {}]  }
   0x1   :  { %8 = vsyncpa [#allocation6], 0 }
   0x2   :  { %9 = vsyncpa [#allocation4], 0  ;;  %s280_s9 = smov [#allocation2]   ;;  %s208_s13 = scalar_lea.hbm %s391_s0, 256 }
   0x3   :  { %s15_s10 = sshll.u32 %s280_s9, 4  ;;  %p209_p0 = scmp.ne.s32.totalorder %s391_s0, %s208_s13  ;;  %s16_s10 = int_to_ptr.vmem [resolvable:$true] %s15_s10 }
   0x4   :  { %p212_p1 = scmp.lt.u32.totalorder %s208_s13, %s391_s0 }
   0x6   :  { %p214_p2 = pnand %p212_p1, %p209_p0 }
   0x8   :  { %217 = shalt.err (!%p214_p2)
}
   0x9   :  { %s218_s18 = scalar_lea.vmem %s16_s10, 256  ;;  %p223_p4 = scmp.lt.s32.totalorder %s16_s10, %s16_s10 }
   0xa   :  { %p219_p3 = scmp.ne.s32.totalorder %s16_s10, %s218_s18  ;;  %p224_p5 = scmp.lt.s32.totalorder %s218_s18, %s218_s18 }
   0xc   :  { %p225_p6 = por %p224_p5, %p223_p4 }
   0xe   :  { %p226_p7 = pnand %p225_p6, %p219_p3 }
  0x10   :  { %229 = shalt.err (!%p226_p7)
}
  0x11   :  { %s281_s19 = smov 32   ;;  %s282_s20 = smov 2  }
  0x12   :  { %21 = dma.hbm_to_vmem [thread:$0]  %s391_s0, 256, %s16_s10, [#allocation3], %s281_s19, %s281_s19, %s282_s20  }
  0x13   :  { %s283_s23 = smov [#allocation5]   ;;  %s230_s27 = scalar_lea.hbm %s392_s1, 64 }
  0x14   :  { %s27_s24 = sshll.u32 %s283_s23, 4  ;;  %p231_p8 = scmp.ne.s32.totalorder %s392_s1, %s230_s27  ;;  %s28_s24 = int_to_ptr.vmem [resolvable:$true] %s27_s24 }
  0x15   :  { %p234_p9 = scmp.lt.u32.totalorder %s230_s27, %s392_s1 }
  0x17   :  { %p236_p10 = pnand %p234_p9, %p231_p8 }
  0x19   :  { %239 = shalt.err (!%p236_p10)
}
  0x1a   :  { %s240_s4 = scalar_lea.vmem %s28_s24, 64  ;;  %p245_p12 = scmp.lt.s32.totalorder %s28_s24, %s28_s24 }
  0x1b   :  { %p241_p11 = scmp.ne.s32.totalorder %s28_s24, %s240_s4  ;;  %p246_p13 = scmp.lt.s32.totalorder %s240_s4, %s240_s4 }
  0x1d   :  { %p247_p0 = por %p246_p13, %p245_p12 }
  0x1f   :  { %p248_p1 = pnand %p247_p0, %p241_p11 }
  0x21   :  { %251 = shalt.err (!%p248_p1)
}
  0x22   :  { %s284_s0 = smov 16   ;;  %s285_s5 = smov 1  }
  0x23   :  { %33 = dma.hbm_to_vmem [thread:$0]  %s392_s1, 64, %s28_s24, [#allocation6], %s284_s0, %s284_s0, %s285_s5  }
  0x24   :  { %274 = dma.done.wait [#allocation3], 256  }
  0x25   :  { %275 = vsyncadd [#allocation3], 4294967040 }
  0x26   :  { %276 = dma.done.wait [#allocation6], 64  }
  0x27   :  { %277 = vsyncadd [#allocation6], 4294967232  ;;  %v286_v0 = vmov 0   ;;  %v192_v1 = vld [vmem:[#allocation5 + $0x2] ss:$0 sm:$0xff]  ;;  %vm48_vm0 = vcmask 1041408  }
  0x28   :  { %203 = vset.pattern.permute.xlu1 %v286_v0  ;;  %202 = vset.pattern.permute.xlu0 %v286_v0  ;;  %v190_v2 = vld [vmem:[#allocation5] ss:$0 sm:$0xff]  ;;  %v193_v3 = vld [vmem:[#allocation5 + $0x3] ss:$0 sm:$0xff]  ;;  %v191_v4 = vld [vmem:[#allocation5 + $0x1] ss:$0 sm:$0xff] }
  0x29   :  { %149 = vperm.xlu1 %203, %v192_v1   ;;  %141 = vperm.xlu0 %202, %v190_v2   ;;  %v330_v5 = vld [vmem:[#allocation2] sm:$0x3]  ;;  %v332_v6 = vld [vmem:[#allocation2 + $0x2] sm:$0x3]  ;;  %v334_v7 = vld [vmem:[#allocation2 + $0x8] sm:$0x3] }
  0x2a   :  { %v336_v8 = vld [vmem:[#allocation2 + $0xa] sm:$0x3]  ;;  %v338_v9 = vld [vmem:[#allocation2 + $0x4] sm:$0x3]  ;;  %v49_v10 = vsel %vm48_vm0, %v330_v5, 0.0  ;;  %v50_v11 = vsel %vm48_vm0, %v332_v6, 0.0  ;;  %v66_v12 = vmul.f32 %v330_v5, %v330_v5  ;;  %v67_v13 = vmul.f32 %v332_v6, %v332_v6 }
  0x2b   :  { %v56_v14 = vsel %vm48_vm0, %v334_v7, 0.0  ;;  %v57_v15 = vsel %vm48_vm0, %v336_v8, 0.0  ;;  %v70_v16 = vmul.f32 %v334_v7, %v334_v7  ;;  %v71_v17 = vmul.f32 %v336_v8, %v336_v8  ;;  %v46_v18 = vld [vmem:[#allocation2 + $0xc] sm:$0x3]  ;;  %v43_v21 = vld [vmem:[#allocation2 + $0x6] sm:$0x3] }
  0x2c   :  { %v51_v19 = vadd.f32 %v50_v11, %v49_v10  ;;  %v68_v20 = vmul.f32 %v338_v9, %v338_v9  ;;  %v52_v22 = vsel %vm48_vm0, %v338_v9, 0.0  ;;  %v58_v23 = vadd.f32 %v57_v15, %v56_v14  ;;  %v47_v30 = vld [vmem:[#allocation2 + $0xe] sm:$0x3]  ;;  %s287_s1 = smov [#allocation7]  }
  0x2d   :  { %153 = vperm.xlu1 %203, %v193_v3   ;;  %145 = vperm.xlu0 %202, %v191_v4   ;;  %v74_v24 = vsel %vm48_vm0, %v66_v12, 0.0  ;;  %v75_v25 = vsel %vm48_vm0, %v67_v13, 0.0  ;;  %v59_v26 = vsel %vm48_vm0, %v46_v18, 0.0  ;;  %v72_v27 = vmul.f32 %v46_v18, %v46_v18  ;;  %s177_s8 = sshll.u32 %s287_s1, 4  ;;  %s178_s8 = int_to_ptr.vmem [resolvable:$true] %s177_s8 }
  0x2e   :  { %v81_v28 = vsel %vm48_vm0, %v70_v16, 0.0  ;;  %v82_v29 = vsel %vm48_vm0, %v71_v17, 0.0  ;;  %v53_v31 = vadd.f32 %v52_v22, %v51_v19  ;;  %v69_v32 = vmul.f32 %v43_v21, %v43_v21  ;;  %s252_s9 = scalar_lea.vmem %s178_s8, 256  ;;  %p257_p3 = scmp.lt.s32.totalorder %s178_s8, %s178_s8 }
  0x2f   :  { %v76_v33 = vadd.f32 %v75_v25, %v74_v24  ;;  %v54_v34 = vsel %vm48_vm0, %v43_v21, 0.0  ;;  %v60_v35 = vadd.f32 %v59_v26, %v58_v23  ;;  %v77_v36 = vsel %vm48_vm0, %v68_v20, 0.0  ;;  %p253_p2 = scmp.ne.s32.totalorder %s178_s8, %s252_s9  ;;  %p258_p4 = scmp.lt.s32.totalorder %s252_s9, %s252_s9 }
  0x30   :  { %v83_v37 = vadd.f32 %v82_v29, %v81_v28  ;;  %v61_v38 = vsel %vm48_vm0, %v47_v30, 0.0  ;;  %v73_v39 = vmul.f32 %v47_v30, %v47_v30  ;;  %v84_v40 = vsel %vm48_vm0, %v72_v27, 0.0 }
  0x31   :  { %v55_v41 = vadd.f32 %v54_v34, %v53_v31  ;;  %v78_v42 = vadd.f32 %v77_v36, %v76_v33  ;;  %v62_v43 = vadd.f32 %v61_v38, %v60_v35  ;;  %v79_v44 = vsel %vm48_vm0, %v69_v32, 0.0  ;;  %p259_p5 = por %p258_p4, %p257_p3 }
  0x32   :  { %v85_v45 = vadd.f32 %v84_v40, %v83_v37  ;;  %v86_v46 = vsel %vm48_vm0, %v73_v39, 0.0 }
  0x33   :  { %v64_v47 = vmul.f32 0.25, %v55_v41  ;;  %v80_v48 = vadd.f32 %v79_v44, %v78_v42  ;;  %v65_v49 = vmul.f32 0.25, %v62_v43  ;;  %p260_p6 = pnand %p259_p5, %p253_p2 }
  0x34   :  { %v87_v50 = vadd.f32 %v86_v46, %v85_v45 }
  0x35   :  { %v88_v51 = vmul.f32 0.25, %v80_v48  ;;  %v90_v52 = vmul.f32 %v64_v47, %v64_v47  ;;  %v91_v54 = vmul.f32 %v65_v49, %v65_v49  ;;  %v102_v62 = vsub.f32 %v338_v9, %v64_v47 }
  0x36   :  { %v89_v53 = vmul.f32 0.25, %v87_v50  ;;  %v106_v63 = vsub.f32 %v46_v18, %v65_v49  ;;  %v100_v0 = vsub.f32 %v330_v5, %v64_v47  ;;  %v104_v1 = vsub.f32 %v334_v7, %v65_v49 }
  0x37   :  { %v92_v55 = vsub.f32 %v88_v51, %v90_v52  ;;  %v103_v3 = vsub.f32 %v43_v21, %v64_v47  ;;  %v107_v4 = vsub.f32 %v47_v30, %v65_v49  ;;  %v101_v10 = vsub.f32 %v332_v6, %v64_v47 }
  0x38   :  { %v93_v56 = vsub.f32 %v89_v53, %v91_v54  ;;  %v105_v11 = vsub.f32 %v336_v8, %v65_v49 }
  0x39   :  { %v94_v57 = vmax.f32 %v92_v55, 0.0 }
  0x3a   :  { %v95_v58 = vmax.f32 %v93_v56, 0.0 }
  0x3b   :  { %v96_v59 = vadd.f32 1e-05, %v94_v57 }
  0x3c   :  { %v97_v60 = vadd.f32 1e-05, %v95_v58 }
  0x3d   :  { %204 = vrsqrt.f32 %v96_v59 }
  0x3e   :  { %206 = vrsqrt.f32 %v97_v60 }
  0x47   :  { %v205_v61 = vpop.eup %204 }
  0x48   :  { %v207_v2 = vpop.eup %206  ;;  %v110_v12 = vmul.f32 %v205_v61, %v102_v62  ;;  %v108_v14 = vmul.f32 %v205_v61, %v100_v0  ;;  %v111_v19 = vmul.f32 %v205_v61, %v103_v3  ;;  %v109_v18 = vmul.f32 %v205_v61, %v101_v10 }
  0x49   :  { %v114_v13 = vmul.f32 %v207_v2, %v106_v63  ;;  %v112_v15 = vmul.f32 %v207_v2, %v104_v1  ;;  %v115_v9 = vmul.f32 %v207_v2, %v107_v4  ;;  %v113_v20 = vmul.f32 %v207_v2, %v105_v11 }
  0xa8   :  { %v150_v16 = vpop.permute.xlu1 %149  ;;  %v142_v17 = vpop.permute.xlu0 %141 }
  0xa9   :  { %v158_v5 = vmul.f32 %v150_v16, %v110_v12  ;;  %v162_v22 = vmul.f32 %v150_v16, %v114_v13  ;;  %v156_v7 = vmul.f32 %v142_v17, %v108_v14  ;;  %v160_v23 = vmul.f32 %v142_v17, %v112_v15 }
  0xab   :  { %166 = vst [vmem:[#allocation7 + $0x4] sm:$0x3] %v158_v5  ;;  %170 = vst [vmem:[#allocation7 + $0xc] sm:$0x3] %v162_v22 }
  0xac   :  { %164 = vst [vmem:[#allocation7] sm:$0x3] %v156_v7  ;;  %168 = vst [vmem:[#allocation7 + $0x8] sm:$0x3] %v160_v23  ;;  %v154_v6 = vpop.permute.xlu1 %153  ;;  %v146_v8 = vpop.permute.xlu0 %145 }
  0xad   :  { %v159_v21 = vmul.f32 %v154_v6, %v111_v19  ;;  %v163_v24 = vmul.f32 %v154_v6, %v115_v9  ;;  %v157_v25 = vmul.f32 %v146_v8, %v109_v18  ;;  %v161_v26 = vmul.f32 %v146_v8, %v113_v20 }
  0xaf   :  { %167 = vst [vmem:[#allocation7 + $0x6] sm:$0x3] %v159_v21  ;;  %171 = vst [vmem:[#allocation7 + $0xe] sm:$0x3] %v163_v24 }
  0xb0   :  { %165 = vst [vmem:[#allocation7 + $0x2] sm:$0x3] %v157_v25  ;;  %169 = vst [vmem:[#allocation7 + $0xa] sm:$0x3] %v161_v26 }
  0xb1   :  { %263 = shalt.err (!%p260_p6)
}
  0xb2   :  { %s264_s12 = scalar_lea.hbm %s393_s2, 256 }
  0xb3   :  { %p265_p7 = scmp.ne.s32.totalorder %s393_s2, %s264_s12  ;;  %p268_p8 = scmp.lt.u32.totalorder %s264_s12, %s393_s2 }
  0xb5   :  { %p270_p9 = pnand %p268_p8, %p265_p7 }
  0xb7   :  { %273 = shalt.err (!%p270_p9)
}
  0xb8   :  { %183 = dma.vmem_to_hbm [thread:$0]  %s178_s8, 256, %s393_s2, [#allocation4], %s281_s19, %s281_s19, %s282_s20  }
  0xb9   :  { %278 = dma.done.wait [#allocation4], 256  }
  0xba   :  { %279 = vsyncadd [#allocation4], 4294967040 }
  0xbb   :  { %187 = vsyncpa [#allocation3], 1 }
  0xbc   :  { %188 = vsyncpa [#allocation6], 1 }
  0xbd   :  { %189 = vsyncpa [#allocation4], 1 }

</bundles_post_ra>
